<compile_context>
chip_gen: v7x
topology: tpu7x:2x2x1
jax: 0.10.0
libtpu: 0.0.40
codegen_flags: <defaults>
</compile_context>

<pallas_src>
import jax
import jax.numpy as jnp
from jax import lax
from jax.experimental import pallas as pl
from jax.experimental.pallas import tpu as pltpu

BN_EPS = 1e-5


# --------------------------------------------------------------------------------------
# Tile / VMEM budgeting
# --------------------------------------------------------------------------------------
def _vmem_limit_bytes():
    """Per-generation scoped-VMEM request: ~48 MiB on v7x (64 MiB/TC), 64 MiB on v5e/v6e."""
    cap = 64 * 1024 * 1024
    try:
        cap = int(getattr(pltpu.get_tpu_info(), "vmem_capacity_bytes", cap))
    except Exception:
        pass
    return max(16 * 1024 * 1024, min(cap * 3 // 4, 64 * 1024 * 1024))


def _pick_hw_tile(hw, chan, vmem_limit, cap):
    """Largest lane-dense HW tile whose double-buffered f32 stream fits half the budget.

    Never exceeds the array extent (last grid block may be partial; Pass A masks it,
    Pass B relies on the masked edge-block store)."""
    if hw <= 128:
        return hw                                  # full extent (block == array dim)
    budget = vmem_limit // 2                       # headroom: scratch, other operands, pipeline
    by_vmem = (budget // (2 * 4 * chan)) // 128 * 128
    return max(128, min(by_vmem, cap, (hw // 128) * 128))


# --------------------------------------------------------------------------------------
# Pass A: tiled global sum over HW  ->  (N*split, Cin, 1) partial sums
# --------------------------------------------------------------------------------------
def _make_pool_sum_kernel(hw, hw_tile):
    chunk_w = min(128, hw_tile)
    n_chunks = hw_tile // chunk_w
    needs_mask = (hw % hw_tile) != 0               # only the last global tile can be ragged

    def kernel(x_ref, sums_ref, acc_ref):
        # x_ref: (Cin, hw_tile) — one HW tile of one batch element (batch dim squeezed)
        # sums_ref: (Cin, 1)    — per-(batch, split) pooled sum (written on last tile)
        # acc_ref:  (Cin, chunk_w) VPU accumulator scratch
        k = pl.program_id(2)

        @pl.when(k == 0)
        def _():
            acc_ref[...] = jnp.zeros_like(acc_ref)

        if needs_mask:
            tile_idx = pl.program_id(1) * pl.num_programs(2) + k
            base = tile_idx * hw_tile
            lane = lax.broadcasted_iota(jnp.int32, (1, chunk_w), 1)   # hoisted out of loop

        # Static Ref slices per 128-lane chunk: only one (Cin, chunk_w) chunk live at a time.
        part = None
        for j in range(n_chunks):
            chunk = x_ref[:, j * chunk_w:(j + 1) * chunk_w]
            if needs_mask:
                chunk = jnp.where(base + j * chunk_w + lane < hw, chunk, 0.0)
            part = chunk if part is None else part + chunk
        acc_ref[...] += part

        @pl.when(k == pl.num_programs(2) - 1)
        def _():
            # Single cross-lane (XLU) reduce per (batch, split).
            sums_ref[...] = jnp.sum(acc_ref[...], axis=-1, keepdims=True)

    return kernel


# --------------------------------------------------------------------------------------
# Pass B: lane-dense broadcast write of the (Cout, 1) column over (Cout, hw_tile)
# --------------------------------------------------------------------------------------
def _broadcast_kernel(y_ref, o_ref):
    o_ref[...] = jnp.broadcast_to(y_ref[...], o_ref.shape).astype(o_ref.dtype)


# --------------------------------------------------------------------------------------
# Wrapper
# --------------------------------------------------------------------------------------
def aspp_pooling(x, conv_w, gamma, beta, running_mean, running_var, *, max_tile=None):
    """x: (N, Cin, H, W) f32. conv_w: (Cout, Cin, 1, 1). Returns (N, Cout, H, W) f32."""
    n, cin, h, w = x.shape
    cout = conv_w.shape[0]
    hw = h * w
    vmem_limit = _vmem_limit_bytes()

    x_flat = x.reshape(n, cin, hw).astype(jnp.float32)

    # ---- Pass A: tiled reduction over HW ------------------------------------------------
    cap_a = max_tile if max_tile is not None else 4096          # ≥512 lanes already ~85% roofline
    tile_a = _pick_hw_tile(hw, cin, vmem_limit, cap_a)
    n_tiles_a = pl.cdiv(hw, tile_a)
    # Extra parallel axis over HW tiles so a v7x megacore can shard the reduction even when
    # N == 1. Only used when tiles divide evenly -> no duplicated DMA on single-core chips.
    split = 2 if (n_tiles_a >= 2 and n_tiles_a % 2 == 0) else 1
    tiles_per_split = n_tiles_a // split

    sums = pl.pallas_call(
        _make_pool_sum_kernel(hw, tile_a),
        out_shape=jax.ShapeDtypeStruct((n * split, cin, 1), jnp.float32),
        grid_spec=pltpu.PrefetchScalarGridSpec(
            num_scalar_prefetch=0,
            grid=(n, split, tiles_per_split),
            in_specs=[
                pl.BlockSpec((None, cin, tile_a),
                             lambda i, s, k: (i, 0, s * tiles_per_split + k)),
            ],
            out_specs=pl.BlockSpec((None, cin, 1),
                                   lambda i, s, k: (i * split + s, 0, 0)),
            scratch_shapes=[pltpu.VMEM((cin, min(128, tile_a)), jnp.float32)],
        ),
        compiler_params=pltpu.CompilerParams(
            dimension_semantics=("parallel", "parallel", "arbitrary"),
            vmem_limit_bytes=vmem_limit,
        ),
    )(x_flat)

    # ---- Tiny fused 1x1 conv (BN folded) + bias + ReLU, batched over N in XLA -----------
    scale = gamma.astype(jnp.float32) * lax.rsqrt(running_var.astype(jnp.float32) + BN_EPS)
    w_fused = conv_w.reshape(cout, cin).astype(jnp.float32) * scale[:, None]   # (Cout, Cin)
    b_fused = beta.astype(jnp.float32) - running_mean.astype(jnp.float32) * scale

    pooled = sums.reshape(n, split, cin).sum(axis=1) * (1.0 / hw)              # (N, Cin)
    y = jnp.maximum(pooled @ w_fused.T + b_fused[None, :], 0.0)                # (N, Cout)
    y_col = y.reshape(n, cout, 1)

    # ---- Pass B: lane-dense broadcast write, unpadded output (masked edge store) --------
    cap_b = max_tile if max_tile is not None else 32768
    tile_b = _pick_hw_tile(hw, cout, vmem_limit, cap_b)
    n_tiles_b = pl.cdiv(hw, tile_b)

    out_flat = pl.pallas_call(
        _broadcast_kernel,
        out_shape=jax.ShapeDtypeStruct((n, cout, hw), jnp.float32),
        grid_spec=pltpu.PrefetchScalarGridSpec(
            num_scalar_prefetch=0,
            grid=(n, n_tiles_b),
            in_specs=[pl.BlockSpec((None, cout, 1), lambda i, k: (i, 0, 0))],
            out_specs=pl.BlockSpec((None, cout, tile_b), lambda i, k: (i, 0, k)),
        ),
        compiler_params=pltpu.CompilerParams(
            dimension_semantics=("parallel", "parallel"),
            vmem_limit_bytes=vmem_limit,
        ),
    )(y_col)

    return out_flat.reshape(n, cout, h, w)


# --------------------------------------------------------------------------------------
# Reference + tests
# --------------------------------------------------------------------------------------
def reference(x, conv_w, gamma, beta, running_mean, running_var):
    """Pure-JAX reference mirroring the PyTorch forward (eval-mode BN)."""
    pooled = jnp.mean(x, axis=(2, 3))                                # (N, Cin)
    y = pooled @ conv_w.reshape(conv_w.shape[0], conv_w.shape[1]).T  # (N, Cout)
    y = (y - running_mean) / jnp.sqrt(running_var + BN_EPS) * gamma + beta
    y = jnp.maximum(y, 0.0)
    h, w = x.shape[-2:]
    return jnp.broadcast_to(y[:, :, None, None], (x.shape[0], y.shape[1], h, w))


def _run_case(key, n, cin, cout, h, w, max_tile=None):
    ks = jax.random.split(key, 6)
    x = jax.random.normal(ks[0], (n, cin, h, w), dtype=jnp.float32)
    conv_w = jax.random.normal(ks[1], (cout, cin, 1, 1), dtype=jnp.float32) * 0.1
    gamma = 1.0 + 0.1 * jax.random.normal(ks[2], (cout,), dtype=jnp.float32)
    beta = 0.1 * jax.random.normal(ks[3], (cout,), dtype=jnp.float32)
    rmean = 0.05 * jax.random.normal(ks[4], (cout,), dtype=jnp.float32)
    rvar = 1.0 + 0.1 * jax.random.uniform(ks[5], (cout,), dtype=jnp.float32)

    out = jax.block_until_ready(
        aspp_pooling(x, conv_w, gamma, beta, rmean, rvar, max_tile=max_tile))
    ref = reference(x, conv_w, gamma, beta, rmean, rvar)
    assert out.shape == (n, cout, h, w), out.shape
    assert jnp.allclose(out, ref, atol=2e-5, rtol=1e-5), float(jnp.max(jnp.abs(out - ref)))


if __name__ == "__main__":
    key = jax.random.PRNGKey(0)
    ks = jax.random.split(key, 5)

    # Base case (small shapes consistent with the module): single full tile, no masking.
    _run_case(ks[0], n=2, cin=4, cout=8, h=16, w=16)
    # Non-multiple-of-128 HW: ragged last tile masked in-kernel, split=2, edge-block store.
    _run_case(ks[1], n=2, cin=4, cout=8, h=15, w=15)
    # HW < 128: full-extent (non-128) block path.
    _run_case(ks[2], n=1, cin=4, cout=8, h=8, w=8)
    # Multi-step accumulation along the "arbitrary" axis with a ragged final tile.
    _run_case(ks[3], n=1, cin=8, cout=16, h=48, w=48, max_tile=512)
    # Split=2 megacore path with multi-step accumulation and exactly-dividing tiles.
    _run_case(ks[4], n=2, cin=8, cout=16, h=48, w=48, max_tile=384)

    print("KERNEL_OK")
</pallas_src>

<mosaic_0001>
module attributes {stable_mosaic.version = 11 : i64} {
  func.func @kernel(%arg0: i32, %arg1: i32, %arg2: i32, %arg3: memref<1x4x256xf32, #tpu.memory_space<vmem>>, %arg4: memref<1x4x1xf32, #tpu.memory_space<vmem>>, %arg5: memref<4x128xf32, #tpu.memory_space<vmem>>) attributes {dimension_semantics = [#tpu.dimension_semantics<parallel>, #tpu.dimension_semantics<parallel>, #tpu.dimension_semantics<arbitrary>], iteration_bounds = array<i64: 2, 1, 1>, scalar_prefetch = 0 : i64, scratch_operands = 1 : i64, tpu.core_type = #tpu.core_type<tc>, window_params = [{transform_indices = @transform_0, window_bounds = array<i64: 1, 4, 256>}, {transform_indices = @transform_1, window_bounds = array<i64: 1, 4, 1>}]} {
    %c0_i32 = arith.constant 0 : i32
    %0 = arith.cmpi eq, %arg2, %c0_i32 : i32
    %1 = arith.extui %0 : i1 to i32
    %c0_i32_0 = arith.constant 0 : i32
    %2 = arith.cmpi ne, %1, %c0_i32_0 : i32
    scf.if %2 {
      %cst = arith.constant 0.000000e+00 : f32
      %14 = vector.broadcast %cst : f32 to vector<4x128xf32>
      %c0_11 = arith.constant 0 : index
      %c0_12 = arith.constant 0 : index
      %15 = vector.load %arg5[%c0_11, %c0_12] : memref<4x128xf32, #tpu.memory_space<vmem>>, vector<4x128xf32>
      tpu.vector_store %arg5[%c0_11, %c0_12], %14 {strides = array<i32>} : memref<4x128xf32, #tpu.memory_space<vmem>>, vector<4x128xf32>,
    } else {
    }
    %c0 = arith.constant 0 : index
    %c0_1 = arith.constant 0 : index
    %c0_2 = arith.constant 0 : index
    %3 = vector.load %arg3[%c0, %c0_1, %c0_2] : memref<1x4x256xf32, #tpu.memory_space<vmem>>, vector<1x4x128xf32>
    %4 = vector.shape_cast %3 : vector<1x4x128xf32> to vector<4x128xf32>
    %c0_3 = arith.constant 0 : index
    %c0_4 = arith.constant 0 : index
    %c128 = arith.constant 128 : index
    %5 = vector.load %arg3[%c0_3, %c0_4, %c128] : memref<1x4x256xf32, #tpu.memory_space<vmem>>, vector<1x4x128xf32>
    %6 = vector.shape_cast %5 : vector<1x4x128xf32> to vector<4x128xf32>
    %7 = arith.addf %4, %6 : vector<4x128xf32>
    %c0_5 = arith.constant 0 : index
    %c0_6 = arith.constant 0 : index
    %8 = vector.load %arg5[%c0_5, %c0_6] : memref<4x128xf32, #tpu.memory_space<vmem>>, vector<4x128xf32>
    %9 = arith.addf %8, %7 : vector<4x128xf32>
    %c0_7 = arith.constant 0 : index
    %c0_8 = arith.constant 0 : index
    %10 = vector.load %arg5[%c0_7, %c0_8] : memref<4x128xf32, #tpu.memory_space<vmem>>, vector<4x128xf32>
    tpu.vector_store %arg5[%c0_7, %c0_8], %9 {strides = array<i32>} : memref<4x128xf32, #tpu.memory_space<vmem>>, vector<4x128xf32>,
    %c0_i32_9 = arith.constant 0 : i32
    %11 = arith.cmpi eq, %arg2, %c0_i32_9 : i32
    %12 = arith.extui %11 : i1 to i32
    %c0_i32_10 = arith.constant 0 : i32
    %13 = arith.cmpi ne, %12, %c0_i32_10 : i32
    scf.if %13 {
      %c0_11 = arith.constant 0 : index
      %c0_12 = arith.constant 0 : index
      %14 = vector.load %arg5[%c0_11, %c0_12] : memref<4x128xf32, #tpu.memory_space<vmem>>, vector<4x128xf32>
      %cst = arith.constant dense<0.000000e+00> : vector<4xf32>
      %15 = vector.multi_reduction <add>, %14, %cst [1] : vector<4x128xf32> to vector<4xf32>
      %16 = vector.shape_cast %15 : vector<4xf32> to vector<4x1xf32>
      %c0_13 = arith.constant 0 : index
      %c0_14 = arith.constant 0 : index
      %c0_15 = arith.constant 0 : index
      %17 = vector.load %arg4[%c0_13, %c0_14, %c0_15] : memref<1x4x1xf32, #tpu.memory_space<vmem>>, vector<1x4x1xf32>
      %18 = vector.shape_cast %17 : vector<1x4x1xf32> to vector<4x1xf32>
      %19 = vector.shape_cast %16 : vector<4x1xf32> to vector<1x4x1xf32>
      tpu.vector_store %arg4[%c0_13, %c0_14, %c0_15], %19 {strides = array<i32>} : memref<1x4x1xf32, #tpu.memory_space<vmem>>, vector<1x4x1xf32>,
    } else {
    }
    return
  }
  func.func @transform_0(%arg0: i32, %arg1: i32, %arg2: i32) -> (i32, i32, i32) {
    %c1_i32 = arith.constant 1 : i32
    %0 = arith.muli %arg1, %c1_i32 : i32
    %1 = arith.addi %0, %arg2 : i32
    %c0_i32 = arith.constant 0 : i32
    %c0_i32_0 = arith.constant 0 : i32
    return %arg0, %c0_i32, %1 : i32, i32, i32
  }
  func.func @transform_1(%arg0: i32, %arg1: i32, %arg2: i32) -> (i32, i32, i32) {
    %c1_i32 = arith.constant 1 : i32
    %0 = arith.muli %arg0, %c1_i32 : i32
    %1 = arith.addi %0, %arg1 : i32
    %c0_i32 = arith.constant 0 : i32
    %c0_i32_0 = arith.constant 0 : i32
    %c0_i32_1 = arith.constant 0 : i32
    return %1, %c0_i32, %c0_i32_0 : i32, i32, i32
  }
}

</mosaic_0001>

<bundles_post_ra>
// kernel: tpu_custom_call.1
= control target key start
LH: loop header
LB: loop body
LE: loop exit
PB: predicated region body
PF: predicated region fallthrough
CT: control target
= control target key end

     0   :  { %6 = vsyncpa [#allocation4], 0  ;;  %s558_s0 = inlined_call_operand.hbm [shape: f32[2,4,256], index: 0, kind: input, shape index: {}]   ;;  %s559_s1 = inlined_call_operand.vmem [shape: f32[2,4,1], index: 1, kind: output, shape index: {}]  }
   0x1   :  { %8 = vsyncpa [#allocation4 + $0x1], 0  ;;  %s433_s6 = smov 0   ;;  %s435_s7 = smov 0  }
   0x2   :  { %s437_s8 = smov 0   ;;  %s439_s9 = smov 0  }
   0x3   :  { %s441_s10 = smov 0   ;;  %s443_s11 = smov 0  }
   0x4 LB: > { %s270_s12 = sadd.s32 4294967295, %s419_s11   ;;  %s33_s13 = sadd.s32 1, %s415_s10  ;;  %s419_s11 = sphi %s443_s11, %s14_s11   ;;  %s415_s10 = sphi %s441_s10, %s569_s10   ;;  %s411_s9 = sphi %s439_s9, %s568_s9   ;;  %s407_s8 = sphi %s437_s8, %s567_s8   ;;  %s403_s7 = sphi %s435_s7, %s566_s7   ;;  %s399_s6 = sphi %s433_s6, %s565_s6  }
   0x5   : > { %p35_p0 = scmp.ge.s32.totalorder %s33_s13, 2  ;;  %s44_s14 = sadd.s32 1, %s407_s8 }
   0x6   : > { %p51_p1 = scmp.ne.s32.totalorder %s407_s8, %s403_s7  ;;  %p52_p2 = scmp.eq.s32.totalorder %s419_s11, 0 }
   0x7   : > { %s571_s13 = smov (%p35_p0, %s33_s13), 0  ;;  %p57_p4 = scmp.ne.s32.totalorder %s403_s7, %s399_s6 }
   0x8   : > { %p469_p3 = por %p52_p2, %p51_p1  ;;  %s39_s16 = ssub.s32 %s415_s10, %s571_s13 }
   0x9   : > { %p58_p5 = scmp.eq.s32.totalorder %s270_s12, 0  ;;  %p42_p6 = scmp.eq.s32.totalorder %s39_s16, 0 }
   0xa   : > { %p289_p8 = scmp.lt.s32.totalorder %s419_s11, 2  ;;  %s109_s19 = sand.u32 1, %s407_s8  }
   0xb   : > { %p476_p7 = por %p58_p5, %p57_p4  ;;  %s282_s20 = sshll.u32 %s415_s10, 7 }
   0xc   : > { %s482_s18 = scalar_select %p42_p6, %s407_s8, %s44_s14  }
   0xd   : > { %s274_s21 = sshll.u32 %s109_s19, 3  ;;  %s489_s24 = scalar_lea.hbm %s558_s0, %s282_s20 }
   0xe   : > { %s113_s25 = scalar_lea.vmem [#allocation3], %s274_s21  ;;  %p493_p9 = pnand %p289_p8, %p469_p3 }
   0xf   : > { %s124_s26 = sshll.u32 %s113_s25, 4  ;;  %s110_s28 = scalar_lea.sflag [#allocation4], %s109_s19  ;;  %s497_s26 = int_to_ptr.vmem [resolvable:$true] %s124_s26 }
  0x10   : > { %s339_s29 = scalar_lea.hbm %s489_s24, 128  ;;  %p341_p13 = pneg %p493_p9 }
  0x11   : > { %p340_p12 = scmp.ne.s32.totalorder %s489_s24, %s339_s29  ;;  %s344_s3 = scalar_lea.hbm %s558_s0, 256 }
  0x12   : > { %p345_p2 = scmp.lt.u32.totalorder %s489_s24, %s558_s0  ;;  %p346_p3 = scmp.lt.u32.totalorder %s344_s3, %s339_s29 }
  0x13   : > { %p342_p0 = pnand %p341_p13, %p340_p12  ;;  %p348_p5 = scmp.lt.u32.totalorder %s339_s29, %s489_s24 }
  0x14   : > { %p347_p4 = por %p346_p3, %p345_p2 }
  0x15   : > { %p343_p1 = pneg %p342_p0 }
  0x16   : > { %p349_p6 = por %p348_p5, %p347_p4 }
  0x18   : > { %p350_p8 = pnand %p349_p6, %p343_p1 }
  0x1a   : > { %353 = shalt.err (!%p350_p8)
}
  0x1b   : > { %s354_s6 = scalar_lea.vmem %s497_s26, 128  ;;  %s421_s12 = smov [#allocation3]  }
  0x1c   : > { %p355_p12 = scmp.ne.s32.totalorder %s497_s26, %s354_s6  ;;  %s359_s14 = sshll.u32 %s421_s12, 4  ;;  %s360_s14 = int_to_ptr.vmem [resolvable:$false] %s359_s14 }
  0x1d   : > { %s361_s15 = scalar_lea.vmem %s360_s14, 256  ;;  %p362_p11 = scmp.lt.s32.totalorder %s497_s26, %s360_s14 }
  0x1e   : > { %p357_p0 = pnand %p355_p12, %p341_p13  ;;  %p363_p2 = scmp.lt.s32.totalorder %s361_s15, %s354_s6 }
  0x20   : > { %p358_p10 = pneg %p357_p0  ;;  %p364_p3 = por %p363_p2, %p362_p11 }
  0x22   : > { %p365_p4 = pnand %p364_p3, %p358_p10 }
  0x24   : > { %368 = shalt.err (!%p365_p4)
}
  0x25   : > { %288 = dma.hbm_to_vmem [thread:$0]  (!%p493_p9), %s489_s24, 128, %s497_s26, %s110_s28  }
  0x26   : > { %p563_p1 = scmp.lt.s32.totalorder %s419_s11, 3  ;;  %p564_p5 = scmp.ge.s32.totalorder %s419_s11, 1 }
  0x28   : > { %p130_p13 = pnand %p564_p5, %p563_p1 }
  0x29   : > { %s135_s16 = sand.u32 (!%p130_p13), 1, %s403_s7  }
  0x2a   : > { %133 = sbr.rel (%p130_p13) target bundleno = 213 (0xd5), region = 24  ;;  %s278_s19 = sshll.u32 (!%p130_p13), %s135_s16, 3 }
  0x2b   : > { %s136_s20 = scalar_lea.sflag (!%p130_p13), [#allocation4], %s135_s16  ;;  %s139_s21 = scalar_lea.vmem (!%p130_p13), [#allocation3], %s278_s19 }
  0x31   : > { %394 = dma.done.wait (%p476_p7), %s136_s20, 128  }
  0x32   : > { %396 = vsyncadd (%p476_p7), %s136_s20, 4294967168  ;;  %v422_v0 = vmov 0.0   ;;  %v171_v1 = vld [vmem:[%s139_s21] sm:$0xf]  ;;  %v172_v2 = vld [vmem:[%s139_s21 + $0x4] sm:$0xf] }
  0x33   : > { %170 = vst [vmem:[#allocation2] sm:$0xf] %v422_v0  ;;  %v173_v3 = vadd.f32 %v172_v2, %v171_v1  ;;  %vm181_vm0 = vcmask 1043456   ;;  %p161_p9 = scmp.lt.s32.totalorder %s411_s9, 1  ;;  %vm185_vm1 = vcmask 3072  }
  0x35   : > { %s573_s9 = smov (!%p161_p9, %s411_s9), 1 }
  0x36   : > { %s279_s22 = sshll.u32 %s573_s9, 2 }
  0x37   : > { %s164_s24 = scalar_lea.vmem %s559_s1, %s279_s22 }
  0x3a   : > { %v174_v4 = vld [vmem:[#allocation2] sm:$0xf] }
  0x3b   : > { %v175_v5 = vadd.f32 %v174_v4, %v173_v3 }
  0x3d   : > { %176 = vst [vmem:[#allocation2] sm:$0xf] %v175_v5 }
  0x44   : > { %v180_v6 = vld [vmem:[#allocation2] sm:$0xf] }
  0x45   : > { %v182_v7 = vsel %vm181_vm0, %v180_v6, 0.0 }
  0x46   : > { %183 = vadd.xlane.f32.xlu0 %v182_v7 }
  0xd3   : > { %v184_v8 = vpop.xlane.xlu0 %183 }
  0xd4   : > { %186 = vst.msk [vmem:[%s164_s24] sm:$0xf] %vm185_vm1, %v184_v8 }
  0xd5 PF: > { %s14_s11 = sadd.s32 1, %s419_s11   ;;  %s565_s6 = smov %s403_s7 }
  0xd6   : > { %p11_p7 = scmp.ge.s32.totalorder %s14_s11, 4   ;;  %s566_s7 = smov %s407_s8 }
  0xd7   : > { %s567_s8 = smov %s482_s18  ;;  %s568_s9 = smov %s415_s10 }
  0xd8   : > { %s569_s10 = smov %s571_s13  ;;  %13 = sbr.rel (!%p11_p7) target bundleno = 4 (0x4), region = 72 }
  0xdf   :  { %209 = vsyncpa [#allocation4], 1 }
  0xe0   :  { %211 = vsyncpa [#allocation4 + $0x1], 1 }

</bundles_post_ra>
